<compile_context>
chip_gen: v5e
topology: v5e:2x2
jax: 0.10.0
libtpu: 0.0.40
codegen_flags: <defaults>
</compile_context>

<pallas_src>
import jax
import jax.numpy as jnp
from jax.experimental import pallas as pl
from jax.experimental.pallas import tpu as pltpu

HIDDEN = 100          # fixed by the PyTorch module (fc1/fc2 width)
_LANE = 128
_SUBLANE = 8
_VMEM_SOFT_CAP = 40 * 1024 * 1024   # per-tile working-set guard (all gens)
_VMEM_LIMIT = 48 * 1024 * 1024      # scoped VMEM limit (< 64 MiB v7x physical)


def _round_up(x, m):
    return ((x + m - 1) // m) * m


def _estimate_vmem_bytes(tb, in_pad, out_pad, h_pad):
    """Generous estimate of the per-grid-step VMEM working set (bytes)."""
    io = 2 * 2 * 4 * tb * (in_pad + out_pad)                     # dbl-buffered f32 in/out
    w = 2 * 2 * (h_pad * in_pad + h_pad * h_pad + out_pad * h_pad)  # bf16 weights (x2 buf)
    b = 2 * 4 * (2 * h_pad + out_pad)                            # f32 biases
    temps = 12 * 4 * tb * h_pad                                  # in-kernel f32/bf16 temporaries
    return io + w + b + temps


def _abs_dynamics_kernel(x_ref, w1_ref, b1_ref, w2_ref, b2_ref, w3_ref, b3_ref,
                         out_ref):
    """One batch tile, feature-major.

    x_ref:   (IN_PAD, TB)  f32   -- rows = [state; action; zero pad], lanes = batch
    w*_ref:  transposed, zero-padded weights (matmul dtype, e.g. bf16)
    b*_ref:  (ROWS, 1) f32 biases (broadcast along lanes)
    out_ref: (OUT_PAD, TB) f32
    All matmuls are W^T @ x so the batch stays on the 128-lane axis: lane-dense
    loads and an unmasked output store.
    """
    x = x_ref[...].astype(w1_ref.dtype)
    h = jnp.dot(w1_ref[...], x, preferred_element_type=jnp.float32)        # fc1
    h = jnp.maximum(h + b1_ref[...], 0.0)                                  # ReLU (f32)
    h = jnp.dot(w2_ref[...], h.astype(w2_ref.dtype),
                preferred_element_type=jnp.float32)                        # fc2
    h = jnp.maximum(h + b2_ref[...], 0.0)                                  # ReLU (f32)
    o = jnp.dot(w3_ref[...], h.astype(w3_ref.dtype),
                preferred_element_type=jnp.float32)                        # fc3
    out_ref[...] = (o + b3_ref[...]).astype(out_ref.dtype)


def absolute_dynamics_forward(state, action, params, *, block_b=4096,
                              matmul_dtype=jnp.bfloat16):
    """Pallas forward of AbsoluteDynamicsModel.

    state:  (..., state_dim) float32
    action: (..., action_dim) float32
    params: dict with w1 (state_dim+action_dim, 100), b1 (100,),
                      w2 (100, 100),                  b2 (100,),
                      w3 (100, state_dim),            b3 (state_dim,)
            (note: transposed w.r.t. PyTorch's nn.Linear (out,in) storage)
    returns: (..., state_dim) float32
    """
    state_dim = state.shape[-1]
    action_dim = action.shape[-1]
    in_dim = state_dim + action_dim
    lead = state.shape[:-1]

    in_pad = _round_up(max(in_dim, 1), _SUBLANE)
    out_pad = _round_up(max(state_dim, 1), _SUBLANE)
    h_pad = _round_up(HIDDEN, _LANE)

    s2 = state.reshape(-1, state_dim).astype(jnp.float32)
    a2 = action.reshape(-1, action_dim).astype(jnp.float32)
    B = s2.shape[0]

    # ---- weights: merged fc1, transposed to "W^T @ x" orientation, zero-padded
    # so all MXU tiles / VPU passes are aligned and unmasked. ----
    w1 = params["w1"].astype(jnp.float32)                     # (in_dim, HIDDEN)
    w2 = params["w2"].astype(jnp.float32)                     # (HIDDEN, HIDDEN)
    w3 = params["w3"].astype(jnp.float32)                     # (HIDDEN, state_dim)

    w1t = jnp.zeros((h_pad, in_pad), jnp.float32).at[:HIDDEN, :in_dim].set(w1.T)
    w2t = jnp.zeros((h_pad, h_pad), jnp.float32).at[:HIDDEN, :HIDDEN].set(w2.T)
    w3t = jnp.zeros((out_pad, h_pad), jnp.float32).at[:state_dim, :HIDDEN].set(w3.T)
    w1t = w1t.astype(matmul_dtype)
    w2t = w2t.astype(matmul_dtype)
    w3t = w3t.astype(matmul_dtype)

    b1 = jnp.zeros((h_pad, 1), jnp.float32).at[:HIDDEN, 0].set(
        params["b1"].astype(jnp.float32))
    b2 = jnp.zeros((h_pad, 1), jnp.float32).at[:HIDDEN, 0].set(
        params["b2"].astype(jnp.float32))
    b3 = jnp.zeros((out_pad, 1), jnp.float32).at[:state_dim, 0].set(
        params["b3"].astype(jnp.float32))

    # ---- batch tiling: batch is the LANE axis (multiples of 128).  Keep >= 2
    # grid steps whenever the batch spans > 1 minimal tile (v7x megacore), and
    # keep the per-step working set under the VMEM budget. ----
    lane_tiles = max(1, (B + _LANE - 1) // _LANE)
    if lane_tiles >= 2:
        half_lanes = ((lane_tiles + 1) // 2) * _LANE
        tb = min(_round_up(max(block_b, _LANE), _LANE), half_lanes)
    else:
        tb = _LANE
    while tb > _LANE and _estimate_vmem_bytes(tb, in_pad, out_pad, h_pad) > _VMEM_SOFT_CAP:
        tb = max(_LANE, _round_up(tb // 2, _LANE))

    bp = _round_up(B, tb)
    grid = (bp // tb,)

    # ---- inputs: concat in XLA (no kernel-side concat), transpose to
    # feature-major so blocks are lane-dense, zero-pad rows and batch. ----
    x = jnp.concatenate([s2, a2], axis=-1)                     # (B, in_dim)
    x_t = jnp.pad(x.T, ((0, in_pad - in_dim), (0, bp - B)))    # (in_pad, bp)

    out = pl.pallas_call(
        _abs_dynamics_kernel,
        out_shape=jax.ShapeDtypeStruct((out_pad, bp), jnp.float32),
        grid=grid,
        in_specs=[
            pl.BlockSpec((in_pad, tb), lambda i: (0, i)),       # x tile (lane-dense)
            pl.BlockSpec((h_pad, in_pad), lambda i: (0, 0)),    # W1^T (merged s/a)
            pl.BlockSpec((h_pad, 1), lambda i: (0, 0)),         # b1
            pl.BlockSpec((h_pad, h_pad), lambda i: (0, 0)),     # W2^T
            pl.BlockSpec((h_pad, 1), lambda i: (0, 0)),         # b2
            pl.BlockSpec((out_pad, h_pad), lambda i: (0, 0)),   # W3^T
            pl.BlockSpec((out_pad, 1), lambda i: (0, 0)),       # b3
        ],
        out_specs=pl.BlockSpec((out_pad, tb), lambda i: (0, i)),
        compiler_params=pltpu.CompilerParams(
            dimension_semantics=("parallel",),   # batch tiles independent -> megacore
            vmem_limit_bytes=_VMEM_LIMIT,
        ),
    )(x_t, w1t, b1, w2t, b2, w3t, b3)

    return out[:state_dim, :B].T.reshape(*lead, state_dim)


def _reference_forward(state, action, params):
    """Pure-JAX mirror of the PyTorch forward (f32 throughout)."""
    x = jnp.concatenate([state, action], axis=-1)
    h = jax.nn.relu(x @ params["w1"] + params["b1"])
    h = jax.nn.relu(h @ params["w2"] + params["b2"])
    return h @ params["w3"] + params["b3"]


def _init_params(key, state_dim, action_dim):
    """PyTorch nn.Linear-style init: U(-1/sqrt(fan_in), 1/sqrt(fan_in))."""
    def linear(k, fan_in, fan_out):
        kw, kb = jax.random.split(k)
        bound = 1.0 / jnp.sqrt(fan_in)
        w = jax.random.uniform(kw, (fan_in, fan_out), jnp.float32, -bound, bound)
        b = jax.random.uniform(kb, (fan_out,), jnp.float32, -bound, bound)
        return w, b

    k1, k2, k3 = jax.random.split(key, 3)
    w1, b1 = linear(k1, state_dim + action_dim, HIDDEN)
    w2, b2 = linear(k2, HIDDEN, HIDDEN)
    w3, b3 = linear(k3, HIDDEN, state_dim)
    return {"w1": w1, "b1": b1, "w2": w2, "b2": b2, "w3": w3, "b3": b3}


if __name__ == "__main__":
    key = jax.random.PRNGKey(0)
    kp, ks, ka = jax.random.split(key, 3)

    state_dim, action_dim, batch = 3, 3, 8
    params = _init_params(kp, state_dim, action_dim)
    state = jax.random.normal(ks, (batch, state_dim), dtype=jnp.float32)
    action = jax.random.normal(ka, (batch, action_dim), dtype=jnp.float32)

    ref = _reference_forward(state, action, params)

    # Strict-correctness path: f32 matmul operands, must match the reference tightly.
    out_f32 = absolute_dynamics_forward(state, action, params,
                                        matmul_dtype=jnp.float32)
    out_f32 = jax.block_until_ready(out_f32)
    assert out_f32.shape == (batch, state_dim), out_f32.shape
    assert jnp.allclose(out_f32, ref, rtol=1e-5, atol=1e-5), (out_f32, ref)

    # Performance path: bf16 matmul operands, f32 accumulation -> loosened tolerance.
    next_state = absolute_dynamics_forward(state, action, params)
    next_state = jax.block_until_ready(next_state)
    assert next_state.shape == (batch, state_dim), next_state.shape
    assert jnp.allclose(next_state, ref, rtol=3e-2, atol=3e-2), (next_state, ref)

    print("KERNEL_OK")
</pallas_src>

<mosaic_0001>
module attributes {stable_mosaic.version = 11 : i64} {
  func.func @_abs_dynamics_kernel(%arg0: i32, %arg1: memref<8x128xf32, #tpu.memory_space<vmem>>, %arg2: memref<128x8xf32, #tpu.memory_space<vmem>>, %arg3: memref<128x1xf32, #tpu.memory_space<vmem>>, %arg4: memref<128x128xf32, #tpu.memory_space<vmem>>, %arg5: memref<128x1xf32, #tpu.memory_space<vmem>>, %arg6: memref<8x128xf32, #tpu.memory_space<vmem>>, %arg7: memref<8x1xf32, #tpu.memory_space<vmem>>, %arg8: memref<8x128xf32, #tpu.memory_space<vmem>>) attributes {dimension_semantics = [#tpu.dimension_semantics<parallel>], iteration_bounds = array<i64: 1>, scalar_prefetch = 0 : i64, scratch_operands = 0 : i64, tpu.core_type = #tpu.core_type<tc>, window_params = [{transform_indices = @transform_0, window_bounds = array<i64: 8, 128>}, {pipeline_mode = #tpu.pipeline_mode<synchronous>, transform_indices = @transform_1, window_bounds = array<i64: 128, 8>}, {pipeline_mode = #tpu.pipeline_mode<synchronous>, transform_indices = @transform_2, window_bounds = array<i64: 128, 1>}, {pipeline_mode = #tpu.pipeline_mode<synchronous>, transform_indices = @transform_3, window_bounds = array<i64: 128, 128>}, {pipeline_mode = #tpu.pipeline_mode<synchronous>, transform_indices = @transform_4, window_bounds = array<i64: 128, 1>}, {pipeline_mode = #tpu.pipeline_mode<synchronous>, transform_indices = @transform_5, window_bounds = array<i64: 8, 128>}, {pipeline_mode = #tpu.pipeline_mode<synchronous>, transform_indices = @transform_6, window_bounds = array<i64: 8, 1>}, {transform_indices = @transform_7, window_bounds = array<i64: 8, 128>}]} {
    %c0 = arith.constant 0 : index
    %c0_0 = arith.constant 0 : index
    %0 = vector.load %arg1[%c0, %c0_0] : memref<8x128xf32, #tpu.memory_space<vmem>>, vector<8x128xf32>
    %c0_1 = arith.constant 0 : index
    %c0_2 = arith.constant 0 : index
    %1 = vector.load %arg2[%c0_1, %c0_2] : memref<128x8xf32, #tpu.memory_space<vmem>>, vector<128x8xf32>
    %cst = arith.constant dense<0.000000e+00> : vector<128x128xf32>
    %2 = tpu.matmul %1, %0, %cst {dimension_numbers = #tpu.dot_dimension_numbers<[1], [0], [0], [1], [0, 0, 1, 1], [], []>} : vector<128x8xf32>, vector<8x128xf32>, vector<128x128xf32> -> vector<128x128xf32>
    %c0_3 = arith.constant 0 : index
    %c0_4 = arith.constant 0 : index
    %3 = vector.load %arg3[%c0_3, %c0_4] : memref<128x1xf32, #tpu.memory_space<vmem>>, vector<128x1xf32>
    %4 = vector.broadcast %3 : vector<128x1xf32> to vector<128x128xf32>
    %5 = arith.addf %2, %4 : vector<128x128xf32>
    %cst_5 = arith.constant 0.000000e+00 : f32
    %6 = vector.broadcast %cst_5 : f32 to vector<128x128xf32>
    %7 = arith.maximumf %5, %6 : vector<128x128xf32>
    %c0_6 = arith.constant 0 : index
    %c0_7 = arith.constant 0 : index
    %8 = vector.load %arg4[%c0_6, %c0_7] : memref<128x128xf32, #tpu.memory_space<vmem>>, vector<128x128xf32>
    %cst_8 = arith.constant dense<0.000000e+00> : vector<128x128xf32>
    %9 = tpu.matmul %8, %7, %cst_8 {dimension_numbers = #tpu.dot_dimension_numbers<[1], [0], [0], [1], [0, 0, 1, 1], [], []>} : vector<128x128xf32>, vector<128x128xf32>, vector<128x128xf32> -> vector<128x128xf32>
    %c0_9 = arith.constant 0 : index
    %c0_10 = arith.constant 0 : index
    %10 = vector.load %arg5[%c0_9, %c0_10] : memref<128x1xf32, #tpu.memory_space<vmem>>, vector<128x1xf32>
    %11 = vector.broadcast %10 : vector<128x1xf32> to vector<128x128xf32>
    %12 = arith.addf %9, %11 : vector<128x128xf32>
    %cst_11 = arith.constant 0.000000e+00 : f32
    %13 = vector.broadcast %cst_11 : f32 to vector<128x128xf32>
    %14 = arith.maximumf %12, %13 : vector<128x128xf32>
    %c0_12 = arith.constant 0 : index
    %c0_13 = arith.constant 0 : index
    %15 = vector.load %arg6[%c0_12, %c0_13] : memref<8x128xf32, #tpu.memory_space<vmem>>, vector<8x128xf32>
    %cst_14 = arith.constant dense<0.000000e+00> : vector<8x128xf32>
    %16 = tpu.matmul %15, %14, %cst_14 {dimension_numbers = #tpu.dot_dimension_numbers<[1], [0], [0], [1], [0, 0, 1, 1], [], []>} : vector<8x128xf32>, vector<128x128xf32>, vector<8x128xf32> -> vector<8x128xf32>
    %c0_15 = arith.constant 0 : index
    %c0_16 = arith.constant 0 : index
    %17 = vector.load %arg7[%c0_15, %c0_16] : memref<8x1xf32, #tpu.memory_space<vmem>>, vector<8x1xf32>
    %18 = vector.broadcast %17 : vector<8x1xf32> to vector<8x128xf32>
    %19 = arith.addf %16, %18 : vector<8x128xf32>
    %c0_17 = arith.constant 0 : index
    %c0_18 = arith.constant 0 : index
    %20 = vector.load %arg8[%c0_17, %c0_18] : memref<8x128xf32, #tpu.memory_space<vmem>>, vector<8x128xf32>
    tpu.vector_store %arg8[%c0_17, %c0_18], %19 {strides = array<i32>} : memref<8x128xf32, #tpu.memory_space<vmem>>, vector<8x128xf32>,
    return
  }
  func.func @transform_0(%arg0: i32) -> (i32, i32) {
    %c0_i32 = arith.constant 0 : i32
    %c0_i32_0 = arith.constant 0 : i32
    return %c0_i32, %arg0 : i32, i32
  }
  func.func @transform_1(%arg0: i32) -> (i32, i32) {
    %c0_i32 = arith.constant 0 : i32
    %c0_i32_0 = arith.constant 0 : i32
    %c0_i32_1 = arith.constant 0 : i32
    return %c0_i32, %c0_i32_0 : i32, i32
  }
  func.func @transform_2(%arg0: i32) -> (i32, i32) {
    %c0_i32 = arith.constant 0 : i32
    %c0_i32_0 = arith.constant 0 : i32
    %c0_i32_1 = arith.constant 0 : i32
    return %c0_i32, %c0_i32_0 : i32, i32
  }
  func.func @transform_3(%arg0: i32) -> (i32, i32) {
    %c0_i32 = arith.constant 0 : i32
    %c0_i32_0 = arith.constant 0 : i32
    %c0_i32_1 = arith.constant 0 : i32
    return %c0_i32, %c0_i32_0 : i32, i32
  }
  func.func @transform_4(%arg0: i32) -> (i32, i32) {
    %c0_i32 = arith.constant 0 : i32
    %c0_i32_0 = arith.constant 0 : i32
    %c0_i32_1 = arith.constant 0 : i32
    return %c0_i32, %c0_i32_0 : i32, i32
  }
  func.func @transform_5(%arg0: i32) -> (i32, i32) {
    %c0_i32 = arith.constant 0 : i32
    %c0_i32_0 = arith.constant 0 : i32
    %c0_i32_1 = arith.constant 0 : i32
    return %c0_i32, %c0_i32_0 : i32, i32
  }
  func.func @transform_6(%arg0: i32) -> (i32, i32) {
    %c0_i32 = arith.constant 0 : i32
    %c0_i32_0 = arith.constant 0 : i32
    %c0_i32_1 = arith.constant 0 : i32
    return %c0_i32, %c0_i32_0 : i32, i32
  }
  func.func @transform_7(%arg0: i32) -> (i32, i32) {
    %c0_i32 = arith.constant 0 : i32
    %c0_i32_0 = arith.constant 0 : i32
    return %c0_i32, %arg0 : i32, i32
  }
}

</mosaic_0001>

<bundles_post_ra>
// kernel: tpu_custom_call.1
= control target key start
LH: loop header
LB: loop body
LE: loop exit
PB: predicated region body
PF: predicated region fallthrough
CT: control target
= control target key end

     0   :  { %v571_v3 = vmov 0   ;;  %vm140_vm0 = vcmask 64512   ;;  %s851_s0 = inlined_call_operand.vmem [shape: f32[8,128], index: 0, kind: input, shape index: {}]   ;;  %s852_s1 = inlined_call_operand.vmem [shape: f32[128,8], index: 1, kind: input, shape index: {}]   ;;  %s853_s2 = inlined_call_operand.vmem [shape: f32[128,1], index: 2, kind: input, shape index: {}]   ;;  %s854_s3 = inlined_call_operand.vmem [shape: f32[128,128], index: 3, kind: input, shape index: {}]   ;;  %s855_s4 = inlined_call_operand.vmem [shape: f32[128,1], index: 4, kind: input, shape index: {}]   ;;  %s856_s5 = inlined_call_operand.vmem [shape: f32[8,128], index: 5, kind: input, shape index: {}]   ;;  %s857_s6 = inlined_call_operand.vmem [shape: f32[8,1], index: 6, kind: input, shape index: {}]   ;;  %s858_s7 = inlined_call_operand.hbm [shape: f32[8,128], index: 7, kind: output, shape index: {}]  }
   0x1   :  { %v27_v0 = vld [vmem:[%s851_s0] sm:$0xff]  ;;  %v59_v1 = vld [vmem:[%s853_s2 + $0x78] sm:$0xff]  ;;  %v57_v2 = vld [vmem:[%s853_s2 + $0x68] sm:$0xff]  ;;  %543 = vset.pattern.permute.xlu1 %v571_v3  ;;  %542 = vset.pattern.permute.xlu0 %v571_v3 }
   0x2   :  { %v28_v4 = vld [vmem:[%s852_s1] sm:$0xff]  ;;  %v39_v5 = vld [vmem:[%s852_s1 + $0x58] sm:$0xff]  ;;  %204 = vmatpush.msra.mxu0 %v27_v0  ;;  %523 = vmatpush.msra.mxu2 %v27_v0  ;;  %v58_v7 = vld [vmem:[%s853_s2 + $0x70] sm:$0xff] }
   0x3   :  { %137 = vperm.xlu0 %542, %v59_v1   ;;  %127 = vperm.xlu1 %543, %v57_v2   ;;  %v55_v6 = vld [vmem:[%s853_s2 + $0x58] sm:$0xff]  ;;  %v56_v8 = vld [vmem:[%s853_s2 + $0x60] sm:$0xff] }
   0x4   :  { %507 = vmatmul.msk.f32.vlgmr.msra.gmra.mxu0 %vm140_vm0, %v28_v4  ;;  %518 = vmatmul.msk.f32.vlgmr.msra.gmra.mxu2 %vm140_vm0, %v39_v5 }
   0x5   :  { %544 = vset.pattern.permute.xlu2 %v571_v3 }
   0x6   :  { %117 = vperm.xlu2 %544, %v55_v6  }
   0x7   :  { %12 = vsyncpa [#allocation3], 0  ;;  %v29_v9 = vld [vmem:[%s852_s1 + $0x8] sm:$0xff]  ;;  %v40_v10 = vld [vmem:[%s852_s1 + $0x60] sm:$0xff]  ;;  %s572_s28 = smov [#allocation2]   ;;  %s498_s9 = sshll.u32 %s858_s7, 4  ;;  %s499_s9 = int_to_ptr.hbm [resolvable:$true] %s498_s9 }
   0x8   :  { %v54_v11 = vld [vmem:[%s853_s2 + $0x50] sm:$0xff]  ;;  %v53_v12 = vld [vmem:[%s853_s2 + $0x48] sm:$0xff]  ;;  %v52_v13 = vld [vmem:[%s853_s2 + $0x40] sm:$0xff]  ;;  %s496_s29 = sshll.u32 %s572_s28, 4  ;;  %s497_s29 = int_to_ptr.vmem [resolvable:$true] %s496_s29 }
   0x9   :  { %v30_v14 = vld [vmem:[%s852_s1 + $0x10] sm:$0xff]  ;;  %v41_v15 = vld [vmem:[%s852_s1 + $0x68] sm:$0xff]  ;;  %v51_v16 = vld [vmem:[%s853_s2 + $0x38] sm:$0xff] }
   0xa   :  { %v50_v17 = vld [vmem:[%s853_s2 + $0x30] sm:$0xff]  ;;  %v49_v18 = vld [vmem:[%s853_s2 + $0x28] sm:$0xff]  ;;  %v31_v19 = vld [vmem:[%s852_s1 + $0x18] sm:$0xff] }
   0xb   :  { %132 = vperm.xlu0 %542, %v58_v7   ;;  %122 = vperm.xlu1 %543, %v56_v8   ;;  %v42_v20 = vld [vmem:[%s852_s1 + $0x70] sm:$0xff]  ;;  %v48_v21 = vld [vmem:[%s853_s2 + $0x20] sm:$0xff]  ;;  %v47_v22 = vld [vmem:[%s853_s2 + $0x18] sm:$0xff] }
   0xc   :  { %508 = vmatmul.msk.f32.gmra.mxu0 %vm140_vm0, %v29_v9  ;;  %519 = vmatmul.msk.f32.gmra.mxu2 %vm140_vm0, %v40_v10  ;;  %v46_v23 = vld [vmem:[%s853_s2 + $0x10] sm:$0xff]  ;;  %v32_v24 = vld [vmem:[%s852_s1 + $0x20] sm:$0xff]  ;;  %v43_v25 = vld [vmem:[%s852_s1 + $0x78] sm:$0xff] }
   0xd   :  { %v45_v26 = vld [vmem:[%s853_s2 + $0x8] sm:$0xff]  ;;  %v301_v27 = vld [vmem:[%s855_s4 + $0x78] sm:$0xff]  ;;  %v44_v28 = vld [vmem:[%s853_s2] sm:$0xff] }
   0xe   :  { %112 = vperm.xlu2 %544, %v54_v11   ;;  %v33_v29 = vld [vmem:[%s852_s1 + $0x28] sm:$0xff]  ;;  %v300_v30 = vld [vmem:[%s855_s4 + $0x70] sm:$0xff]  ;;  %v298_v31 = vld [vmem:[%s855_s4 + $0x60] sm:$0xff] }
   0xf   :  { %v299_v32 = vld [vmem:[%s855_s4 + $0x68] sm:$0xff]  ;;  %v34_v33 = vld [vmem:[%s852_s1 + $0x30] sm:$0xff]  ;;  %v297_v34 = vld [vmem:[%s855_s4 + $0x58] sm:$0xff] }
  0x10   :  { %v295_v35 = vld [vmem:[%s855_s4 + $0x48] sm:$0xff]  ;;  %v296_v36 = vld [vmem:[%s855_s4 + $0x50] sm:$0xff]  ;;  %v35_v37 = vld [vmem:[%s852_s1 + $0x38] sm:$0xff] }
  0x11   :  { %v294_v38 = vld [vmem:[%s855_s4 + $0x40] sm:$0xff]  ;;  %v292_v39 = vld [vmem:[%s855_s4 + $0x30] sm:$0xff]  ;;  %v293_v40 = vld [vmem:[%s855_s4 + $0x38] sm:$0xff] }
  0x12   :  { %v36_v41 = vld [vmem:[%s852_s1 + $0x40] sm:$0xff]  ;;  %v291_v42 = vld [vmem:[%s855_s4 + $0x28] sm:$0xff]  ;;  %v289_v43 = vld [vmem:[%s855_s4 + $0x18] sm:$0xff] }
  0x13   :  { %107 = vperm.xlu0 %542, %v53_v12   ;;  %102 = vperm.xlu1 %543, %v52_v13   ;;  %v290_v44 = vld [vmem:[%s855_s4 + $0x20] sm:$0xff]  ;;  %v37_v45 = vld [vmem:[%s852_s1 + $0x48] sm:$0xff]  ;;  %v288_v46 = vld [vmem:[%s855_s4 + $0x10] sm:$0xff] }
  0x14   :  { %509 = vmatmul.msk.f32.gmra.mxu0 %vm140_vm0, %v30_v14  ;;  %520 = vmatmul.msk.f32.gmra.mxu2 %vm140_vm0, %v41_v15  ;;  %v286_v47 = vld [vmem:[%s855_s4] sm:$0xff]  ;;  %v287_v48 = vld [vmem:[%s855_s4 + $0x8] sm:$0xff]  ;;  %v38_v49 = vld [vmem:[%s852_s1 + $0x50] sm:$0xff] }
  0x15   :  { %v464_v50 = vld [vmem:[%s857_s6] sm:$0xff] }
  0x16   :  { %97 = vperm.xlu2 %544, %v51_v16  }
  0x1b   :  { %92 = vperm.xlu0 %542, %v50_v17   ;;  %87 = vperm.xlu1 %543, %v49_v18  }
  0x1c   :  { %510 = vmatmul.msk.f32.gmra.mxu0 %vm140_vm0, %v31_v19  ;;  %521 = vmatmul.msk.f32.gmra.mxu2 %vm140_vm0, %v42_v20 }
  0x1e   :  { %82 = vperm.xlu2 %544, %v48_v21  }
  0x23   :  { %77 = vperm.xlu0 %542, %v47_v22   ;;  %72 = vperm.xlu1 %543, %v46_v23  }
  0x24   :  { %511 = vmatmul.msk.f32.gmra.mxu0 %vm140_vm0, %v32_v24  ;;  %522 = vmatmul.msk.f32.gmra.mxu2 %vm140_vm0, %v43_v25 }
  0x26   :  { %67 = vperm.xlu2 %544, %v45_v26  }
  0x2b   :  { %379 = vperm.xlu1 %543, %v301_v27   ;;  %62 = vperm.xlu0 %542, %v44_v28  }
  0x2c   :  { %512 = vmatmul.msk.f32.gmra.mxu0 %vm140_vm0, %v33_v29 }
  0x2e   :  { %374 = vperm.xlu2 %544, %v300_v30  }
  0x33   :  { %364 = vperm.xlu1 %543, %v298_v31   ;;  %369 = vperm.xlu0 %542, %v299_v32  }
  0x34   :  { %513 = vmatmul.msk.f32.gmra.mxu0 %vm140_vm0, %v34_v33 }
  0x36   :  { %359 = vperm.xlu2 %544, %v297_v34  }
  0x3b   :  { %349 = vperm.xlu1 %543, %v295_v35   ;;  %354 = vperm.xlu0 %542, %v296_v36  }
  0x3c   :  { %514 = vmatmul.msk.f32.gmra.mxu0 %vm140_vm0, %v35_v37 }
  0x3e   :  { %344 = vperm.xlu2 %544, %v294_v38  }
  0x43   :  { %334 = vperm.xlu1 %543, %v292_v39   ;;  %339 = vperm.xlu0 %542, %v293_v40  }
  0x44   :  { %515 = vmatmul.msk.f32.gmra.mxu0 %vm140_vm0, %v36_v41 }
  0x46   :  { %329 = vperm.xlu2 %544, %v291_v42  }
  0x4b   :  { %319 = vperm.xlu1 %543, %v289_v43   ;;  %324 = vperm.xlu0 %542, %v290_v44  }
  0x4c   :  { %516 = vmatmul.msk.f32.gmra.mxu0 %vm140_vm0, %v37_v45 }
  0x4e   :  { %314 = vperm.xlu2 %544, %v288_v46  }
  0x53   :  { %304 = vperm.xlu1 %543, %v286_v47   ;;  %309 = vperm.xlu0 %542, %v287_v48  }
  0x54   :  { %517 = vmatmul.msk.f32.gmra.mxu0 %vm140_vm0, %v38_v49 }
  0x56   :  { %467 = vperm.xlu2 %544, %v464_v50  }
  0x60   :  { %v118_v9 = vpop.permute.xlu2 %117 }
  0x68   :  { %v113_v15 = vpop.permute.xlu2 %112 }
  0x70   :  { %v98_v20 = vpop.permute.xlu2 %97 }
  0x75   :  { %v138_v58 = vpop.permute.xlu0 %137  ;;  %v128_v59 = vpop.permute.xlu1 %127 }
  0x78   :  { %v83_v28 = vpop.permute.xlu2 %82 }
  0x7d   :  { %v133_v62 = vpop.permute.xlu0 %132  ;;  %v123_v3 = vpop.permute.xlu1 %122 }
  0x80   :  { %v68_v41 = vpop.permute.xlu2 %67 }
  0x81   :  { %v779_v51 = vpop.f32.mrf.mxu0 }
  0x85   :  { %v108_v17 = vpop.permute.xlu0 %107  ;;  %v103_v18 = vpop.permute.xlu1 %102 }
  0x87   :  { %v239_v52 = vpop.f32.mrf.mxu2 }
  0x88   :  { %v240_v10 = vadd.f32 %v239_v52, %v118_v9  ;;  %v270_v52 = vld [vmem:[%s854_s3] sm:$0xff] }
  0x89   :  { %v781_v53 = vpop.f32.mrf.mxu0 }
  0x8a   :  { %v265_v13 = vmax.f32 %v240_v10, 0.0  ;;  %v210_v45 = vadd.f32 %v781_v53, %v68_v41  ;;  %v278_v53 = vld [vmem:[%s854_s3 + $0x40] sm:$0xff] }
  0x8c   :  { %v255_v49 = vmax.f32 %v210_v45, 0.0 }
  0x8d   :  { %v93_v21 = vpop.permute.xlu0 %92  ;;  %v88_v25 = vpop.permute.xlu1 %87 }
  0x8f   :  { %v242_v54 = vpop.f32.mrf.mxu2 }
  0x90   :  { %v243_v5 = vadd.f32 %v242_v54, %v123_v3  ;;  %v279_v54 = vld [vmem:[%s854_s3 + $0x48] sm:$0xff] }
  0x91   :  { %v783_v55 = vpop.f32.mrf.mxu0 }
  0x92   :  { %v266_v11 = vmax.f32 %v243_v5, 0.0 }
  0x95   :  { %v78_v31 = vpop.permute.xlu0 %77  ;;  %v73_v38 = vpop.permute.xlu1 %72 }
  0x96   :  { %v213_v42 = vadd.f32 %v783_v55, %v73_v38  ;;  %v272_v55 = vld [vmem:[%s854_s3 + $0x10] sm:$0xff] }
  0x97   :  { %v245_v56 = vpop.f32.mrf.mxu2 }
  0x98   :  { %v246_v1 = vadd.f32 %v245_v56, %v128_v59  ;;  %v256_v47 = vmax.f32 %v213_v42, 0.0  ;;  %v280_v56 = vld [vmem:[%s854_s3 + $0x50] sm:$0xff]  ;;  %v274_v59 = vld [vmem:[%s854_s3 + $0x20] sm:$0xff] }
  0x99   :  { %v785_v57 = vpop.f32.mrf.mxu0 }
  0x9a   :  { %v267_v8 = vmax.f32 %v246_v1, 0.0  ;;  %v216_v39 = vadd.f32 %v785_v57, %v78_v31  ;;  %v273_v57 = vld [vmem:[%s854_s3 + $0x18] sm:$0xff] }
  0x9b   :  { %v277_v1 = vld [vmem:[%s854_s3 + $0x38] sm:$0xff] }
  0x9c   :  { %v257_v46 = vmax.f32 %v216_v39, 0.0 }
  0x9d   :  { %v63_v44 = vpop.permute.xlu0 %62 }
  0x9e   :  { %v207_v48 = vadd.f32 %v779_v51, %v63_v44  ;;  %v271_v51 = vld [vmem:[%s854_s3 + $0x8] sm:$0xff] }
  0x9f   :  { %v248_v60 = vpop.f32.mrf.mxu2 }
  0xa0   :  { %v249_v63 = vadd.f32 %v248_v60, %v133_v62  ;;  %v254_v50 = vmax.f32 %v207_v48, 0.0  ;;  %v282_v60 = vld [vmem:[%s854_s3 + $0x60] sm:$0xff]  ;;  %v283_v62 = vld [vmem:[%s854_s3 + $0x68] sm:$0xff] }
  0xa1   :  { %v218_v61 = vpop.f32.mrf.mxu0 }
  0xa2   :  { %v268_v6 = vmax.f32 %v249_v63, 0.0  ;;  %v219_v36 = vadd.f32 %v218_v61, %v83_v28  ;;  %v275_v61 = vld [vmem:[%s854_s3 + $0x28] sm:$0xff]  ;;  %v276_v63 = vld [vmem:[%s854_s3 + $0x30] sm:$0xff] }
  0xa4   :  { %v258_v43 = vmax.f32 %v219_v36, 0.0 }
  0xa7   :  { %v251_v0 = vpop.f32.mrf.mxu2 }
  0xa8   :  { %v252_v2 = vadd.f32 %v251_v0, %v138_v58  ;;  %v281_v58 = vld [vmem:[%s854_s3 + $0x58] sm:$0xff]  ;;  %v284_v0 = vld [vmem:[%s854_s3 + $0x70] sm:$0xff] }
  0xa9   :  { %v221_v4 = vpop.f32.mrf.mxu0 }
  0xaa   :  { %v269_v7 = vmax.f32 %v252_v2, 0.0  ;;  %v222_v34 = vadd.f32 %v221_v4, %v88_v25  ;;  %v285_v2 = vld [vmem:[%s854_s3 + $0x78] sm:$0xff] }
  0xac   :  { %382 = vmatpush.msra.mxu1 %v269_v7  ;;  %524 = vmatpush.msra.mxu3 %v269_v7  ;;  %v259_v40 = vmax.f32 %v222_v34, 0.0 }
  0xae   :  { %383 = vmatpush.msra.mxu1 %v268_v6  ;;  %525 = vmatpush.msra.mxu3 %v268_v6 }
  0xb0   :  { %384 = vmatpush.msra.mxu1 %v267_v8  ;;  %526 = vmatpush.msra.mxu3 %v267_v8 }
  0xb1   :  { %v224_v12 = vpop.f32.mrf.mxu0 }
  0xb2   :  { %385 = vmatpush.msra.mxu1 %v266_v11  ;;  %527 = vmatpush.msra.mxu3 %v266_v11  ;;  %v225_v32 = vadd.f32 %v224_v12, %v93_v21  ;;  %v380_v12 = vpop.permute.xlu1 %379 }
  0xb4   :  { %386 = vmatpush.msra.mxu1 %v265_v13  ;;  %528 = vmatpush.msra.mxu3 %v265_v13  ;;  %v260_v37 = vmax.f32 %v225_v32, 0.0 }
  0xb9   :  { %v227_v14 = vpop.f32.mrf.mxu0 }
  0xba   :  { %v228_v29 = vadd.f32 %v227_v14, %v98_v20  ;;  %v375_v14 = vpop.permute.xlu2 %374 }
  0xbc   :  { %v261_v35 = vmax.f32 %v228_v29, 0.0 }
  0xc1   :  { %v230_v16 = vpop.f32.mrf.mxu0 }
  0xc2   :  { %v231_v26 = vadd.f32 %v230_v16, %v103_v18  ;;  %v370_v16 = vpop.permute.xlu0 %369  ;;  %v360_v20 = vpop.permute.xlu2 %359 }
  0xc4   :  { %v262_v33 = vmax.f32 %v231_v26, 0.0 }
  0xc9   :  { %v233_v19 = vpop.f32.mrf.mxu0 }
  0xca   :  { %v234_v23 = vadd.f32 %v233_v19, %v108_v17  ;;  %v365_v17 = vpop.permute.xlu1 %364  ;;  %v355_v21 = vpop.permute.xlu0 %354 }
  0xcb   :  { %v345_v29 = vpop.permute.xlu2 %344 }
  0xcc   :  { %v263_v30 = vmax.f32 %v234_v23, 0.0 }
  0xd1   :  { %v236_v22 = vpop.f32.mrf.mxu0 }
  0xd2   :  { %v237_v24 = vadd.f32 %v236_v22, %v113_v15  ;;  %v350_v22 = vpop.permute.xlu1 %349  ;;  %v340_v32 = vpop.permute.xlu0 %339 }
  0xd4   :  { %v264_v27 = vmax.f32 %v237_v24, 0.0 }
  0xd6   :  { %387 = vmatpush.msra.mxu1 %v264_v27  ;;  %529 = vmatpush.msra.mxu3 %v264_v27 }
  0xd8   :  { %388 = vmatpush.msra.mxu1 %v263_v30  ;;  %530 = vmatpush.msra.mxu3 %v263_v30 }
  0xda   :  { %389 = vmatpush.msra.mxu1 %v262_v33  ;;  %531 = vmatpush.msra.mxu3 %v262_v33 }
  0xdc   :  { %390 = vmatpush.msra.mxu1 %v261_v35  ;;  %532 = vmatpush.msra.mxu3 %v261_v35  ;;  %v335_v35 = vpop.permute.xlu1 %334 }
  0xde   :  { %391 = vmatpush.msra.mxu1 %v260_v37  ;;  %533 = vmatpush.msra.mxu3 %v260_v37 }
  0xe0   :  { %392 = vmatpush.msra.mxu1 %v259_v40  ;;  %534 = vmatpush.msra.mxu3 %v259_v40 }
  0xe2   :  { %393 = vmatpush.msra.mxu1 %v258_v43  ;;  %535 = vmatpush.msra.mxu3 %v258_v43  ;;  %v330_v43 = vpop.permute.xlu2 %329 }
  0xe4   :  { %394 = vmatpush.msra.mxu1 %v257_v46  ;;  %536 = vmatpush.msra.mxu3 %v257_v46  ;;  %v325_v46 = vpop.permute.xlu0 %324 }
  0xe6   :  { %395 = vmatpush.msra.mxu1 %v256_v47  ;;  %537 = vmatpush.msra.mxu3 %v256_v47 }
  0xe8   :  { %396 = vmatpush.msra.mxu1 %v255_v49  ;;  %538 = vmatpush.msra.mxu3 %v255_v49  ;;  %v320_v49 = vpop.permute.xlu1 %319 }
  0xea   :  { %397 = vmatpush.msra.mxu1 %v254_v50  ;;  %539 = vmatpush.msra.mxu3 %v254_v50 }
  0xeb   :  { %398 = vmatmul.f32.vlgmr.msra.gmra.mxu1 %v270_v52  ;;  %422 = vmatmul.f32.vlgmr.msra.gmra.mxu3 %v278_v53 }
  0xf3   :  { %401 = vmatmul.f32.gmra.mxu1 %v271_v51  ;;  %425 = vmatmul.f32.gmra.mxu3 %v279_v54 }
  0xfb   :  { %404 = vmatmul.f32.gmra.mxu1 %v272_v55  ;;  %428 = vmatmul.f32.gmra.mxu3 %v280_v56  ;;  %v315_v56 = vpop.permute.xlu2 %314 }
 0x103   :  { %407 = vmatmul.f32.gmra.mxu1 %v273_v57  ;;  %431 = vmatmul.f32.gmra.mxu3 %v281_v58 }
 0x10b   :  { %410 = vmatmul.f32.gmra.mxu1 %v274_v59  ;;  %434 = vmatmul.f32.gmra.mxu3 %v282_v60  ;;  %v310_v59 = vpop.permute.xlu0 %309 }
 0x113   :  { %413 = vmatmul.f32.gmra.mxu1 %v275_v61  ;;  %437 = vmatmul.f32.gmra.mxu3 %v283_v62  ;;  %v305_v62 = vpop.permute.xlu1 %304 }
 0x11b   :  { %416 = vmatmul.f32.gmra.mxu1 %v276_v63  ;;  %440 = vmatmul.f32.gmra.mxu3 %v284_v0 }
 0x123   :  { %419 = vmatmul.f32.gmra.mxu1 %v277_v1  ;;  %443 = vmatmul.f32.gmra.mxu3 %v285_v2 }
 0x168   :  { %v839_v3 = vpop.f32.mrf.mxu1 }
 0x169   :  { %v400_v63 = vadd.f32 %v839_v3, %v305_v62 }
 0x16b   :  { %v447_v2 = vmax.f32 %v400_v63, 0.0 }
 0x16e   :  { %v423_v4 = vpop.f32.mrf.mxu3 }
 0x16f   :  { %v424_v41 = vadd.f32 %v423_v4, %v345_v29  ;;  %v463_v4 = vld [vmem:[%s856_s5] sm:$0xff] }
 0x170   :  { %v841_v5 = vpop.f32.mrf.mxu1 }
 0x171   :  { %v455_v47 = vmax.f32 %v424_v41, 0.0  ;;  %v403_v60 = vadd.f32 %v841_v5, %v310_v59  ;;  %v468_v5 = vpop.permute.xlu2 %467 }
 0x173   :  { %v448_v1 = vmax.f32 %v403_v60, 0.0 }
 0x176   :  { %v426_v6 = vpop.f32.mrf.mxu3 }
 0x177   :  { %v427_v38 = vadd.f32 %v426_v6, %v350_v22 }
 0x178   :  { %v405_v8 = vpop.f32.mrf.mxu1 }
 0x179   :  { %v456_v44 = vmax.f32 %v427_v38, 0.0  ;;  %v406_v57 = vadd.f32 %v405_v8, %v315_v56 }
 0x17b   :  { %v449_v0 = vmax.f32 %v406_v57, 0.0 }
 0x17e   :  { %v429_v7 = vpop.f32.mrf.mxu3 }
 0x17f   :  { %v430_v36 = vadd.f32 %v429_v7, %v355_v21 }
 0x180   :  { %v408_v10 = vpop.f32.mrf.mxu1 }
 0x181   :  { %v457_v42 = vmax.f32 %v430_v36, 0.0  ;;  %v409_v54 = vadd.f32 %v408_v10, %v320_v49 }
 0x183   :  { %v450_v61 = vmax.f32 %v409_v54, 0.0 }
 0x186   :  { %v432_v9 = vpop.f32.mrf.mxu3 }
 0x187   :  { %v433_v33 = vadd.f32 %v432_v9, %v360_v20 }
 0x188   :  { %v411_v13 = vpop.f32.mrf.mxu1 }
 0x189   :  { %v458_v39 = vmax.f32 %v433_v33, 0.0  ;;  %v412_v53 = vadd.f32 %v411_v13, %v325_v46 }
 0x18b   :  { %v451_v58 = vmax.f32 %v412_v53, 0.0 }
 0x18e   :  { %v435_v11 = vpop.f32.mrf.mxu3 }
 0x18f   :  { %v436_v30 = vadd.f32 %v435_v11, %v365_v17 }
 0x190   :  { %v414_v18 = vpop.f32.mrf.mxu1 }
 0x191   :  { %v459_v37 = vmax.f32 %v436_v30, 0.0  ;;  %v415_v50 = vadd.f32 %v414_v18, %v330_v43 }
 0x193   :  { %v452_v55 = vmax.f32 %v415_v50, 0.0 }
 0x196   :  { %v438_v15 = vpop.f32.mrf.mxu3 }
 0x197   :  { %v439_v27 = vadd.f32 %v438_v15, %v370_v16 }
 0x198   :  { %v417_v26 = vpop.f32.mrf.mxu1 }
 0x199   :  { %v460_v34 = vmax.f32 %v439_v27, 0.0  ;;  %v418_v48 = vadd.f32 %v417_v26, %v335_v35 }
 0x19b   :  { %v453_v51 = vmax.f32 %v418_v48, 0.0 }
 0x19e   :  { %v441_v19 = vpop.f32.mrf.mxu3 }
 0x19f   :  { %v442_v24 = vadd.f32 %v441_v19, %v375_v14 }
 0x1a0   :  { %v420_v40 = vpop.f32.mrf.mxu1 }
 0x1a1   :  { %v461_v31 = vmax.f32 %v442_v24, 0.0  ;;  %v421_v45 = vadd.f32 %v420_v40, %v340_v32 }
 0x1a3   :  { %v454_v52 = vmax.f32 %v421_v45, 0.0 }
 0x1a6   :  { %v444_v23 = vpop.f32.mrf.mxu3 }
 0x1a7   :  { %v445_v25 = vadd.f32 %v444_v23, %v380_v12 }
 0x1a9   :  { %v462_v28 = vmax.f32 %v445_v25, 0.0 }
 0x1ab   :  { %470 = vmatpush.msrb.mxu2 %v462_v28 }
 0x1ad   :  { %471 = vmatpush.msrb.mxu2 %v461_v31 }
 0x1af   :  { %472 = vmatpush.msrb.mxu2 %v460_v34 }
 0x1b1   :  { %473 = vmatpush.msrb.mxu2 %v459_v37 }
 0x1b3   :  { %474 = vmatpush.msrb.mxu2 %v458_v39 }
 0x1b5   :  { %475 = vmatpush.msrb.mxu2 %v457_v42 }
 0x1b7   :  { %476 = vmatpush.msrb.mxu2 %v456_v44 }
 0x1b9   :  { %477 = vmatpush.msrb.mxu2 %v455_v47 }
 0x1bb   :  { %478 = vmatpush.msrb.mxu2 %v454_v52 }
 0x1bd   :  { %479 = vmatpush.msrb.mxu2 %v453_v51 }
 0x1bf   :  { %480 = vmatpush.msrb.mxu2 %v452_v55 }
 0x1c1   :  { %481 = vmatpush.msrb.mxu2 %v451_v58 }
 0x1c3   :  { %482 = vmatpush.msrb.mxu2 %v450_v61 }
 0x1c5   :  { %483 = vmatpush.msrb.mxu2 %v449_v0 }
 0x1c7   :  { %484 = vmatpush.msrb.mxu2 %v448_v1 }
 0x1c9   :  { %485 = vmatpush.msrb.mxu2 %v447_v2 }
 0x1ca   :  { %486 = vmatmul.f32.vlgmr.msrb.gmra.mxu2 %v463_v4 }
 0x24d   :  { %v487_v3 = vpop.f32.mrf.mxu2 }
 0x24e   :  { %v488_v6 = vadd.f32 %v487_v3, %v468_v5 }
 0x250   :  { %490 = vst [vmem:[#allocation2] sm:$0xff] %v488_v6 }
 0x251   :  { %501 = dma.vmem_to_hbm [thread:$0]  %s497_s29, 128, %s499_s9, [#allocation3]  }
 0x252   :  { %569 = dma.done.wait [#allocation3], 128  }
 0x253   :  { %570 = vsyncadd [#allocation3], 4294967168 }
 0x254   :  { %506 = vsyncpa [#allocation3], 1 }

</bundles_post_ra>
